<compile_context>
chip_gen: v7x
topology: tpu7x:2x2x1
jax: 0.10.0
libtpu: 0.0.40
codegen_flags: <defaults>
</compile_context>

<pallas_src>
import functools

import jax
import jax.numpy as jnp
from jax.experimental import pallas as pl
from jax.experimental.pallas import tpu as pltpu

LANE = 128            # output feature dim is padded to a multiple of this
MAX_TILE_B = 1024     # biggest batch tile (obs tile 1024x512xf32 = 2 MiB, x2 pipeline bufs)
MIN_MEGACORE_B = 512  # above this, force >= 2 grid steps so v7x's two TCs both get work


def _round_up(x, m):
    return (x + m - 1) // m * m


def _sublane(dtype):
    """Sublane tile for a dtype: 8 for f32, 16 for bf16, 32 for int8/fp8."""
    return max(8, 32 // jnp.dtype(dtype).itemsize)


def _batch_tile(B, sublane):
    """Batch tile size.  For large B, guarantee >= 2 grid steps (v7x megacore)."""
    if B >= MIN_MEGACORE_B:
        half = _round_up(pl.cdiv(B, 2), 256)   # 256 is a multiple of every sublane tile
        return min(MAX_TILE_B, half)
    return min(MAX_TILE_B, _round_up(B, sublane))


# ----------------------------- Pallas kernels -------------------------------

def _linear_kernel(x_ref, w_ref, b_ref, o_ref):
    """o = x @ W + b.  x:[TILE_B,D] (stored dtype), w:[D,N_pad] (MXU dtype),
    b:[1,N_pad] f32, o:[TILE_B,N_pad].  f32 accumulation, f32 bias epilogue."""
    x = x_ref[...].astype(w_ref.dtype)            # in-kernel cast, no extra HBM pass
    acc = jnp.dot(x, w_ref[...], preferred_element_type=jnp.float32)
    o_ref[...] = (acc + b_ref[...]).astype(o_ref.dtype)


def _mlp_kernel(x_ref, w1_ref, b1_ref, w2_ref, b2_ref, w3_ref, b3_ref, o_ref):
    """ReLU(ReLU(x@W1+b1)@W2+b2)@W3+b3.  Hidden width 256 is lane/MXU aligned;
    intermediates stay f32 at [TILE_B, 256] and are cast only at the MXU boundary."""
    dt = w1_ref.dtype
    h = jnp.dot(x_ref[...].astype(dt), w1_ref[...], preferred_element_type=jnp.float32)
    h = jnp.maximum(h + b1_ref[...], 0.0)
    h = jnp.dot(h.astype(dt), w2_ref[...], preferred_element_type=jnp.float32)
    h = jnp.maximum(h + b2_ref[...], 0.0)
    h = jnp.dot(h.astype(dt), w3_ref[...], preferred_element_type=jnp.float32)
    o_ref[...] = (h + b3_ref[...]).astype(o_ref.dtype)


# ----------------------- one-time parameter preparation ----------------------
# Padding / casting happens ONCE here (init time), not per forward call.

def _pad_weight(w, n_pad, dtype):
    d, n = w.shape
    return jnp.zeros((d, n_pad), dtype).at[:, :n].set(w.astype(dtype))


def _pad_bias(b, n_pad):
    n = b.shape[0]
    return jnp.zeros((1, n_pad), jnp.float32).at[:, :n].set(b.astype(jnp.float32))


def prepare_linear_params(w, b, *, compute_dtype=jnp.bfloat16):
    """bdd100k/cityscapes/kitti head.  w:[512,N] ([in,out]), b:[N].
    Returns lane-padded, MXU-dtype weight and f32 bias, ready for dqn_forward_linear."""
    n = w.shape[1]
    n_pad = _round_up(max(n, LANE), LANE)
    return _pad_weight(w, n_pad, compute_dtype), _pad_bias(b, n_pad)


def prepare_mlp_params(params, *, compute_dtype=jnp.bfloat16):
    """Non-image-dataset head (n_layers=3).  params=(w1,b1,w2,b2,w3,b3), w_i stored [in,out]."""
    w1, b1, w2, b2, w3, b3 = params
    h = w1.shape[1]
    n = w3.shape[1]
    n_pad = _round_up(max(n, LANE), LANE)
    return (w1.astype(compute_dtype), b1.astype(jnp.float32).reshape(1, h),
            w2.astype(compute_dtype), b2.astype(jnp.float32).reshape(1, h),
            _pad_weight(w3, n_pad, compute_dtype), _pad_bias(b3, n_pad))


# ------------------------------ forward wrappers ------------------------------

@functools.partial(jax.jit, static_argnames=("n_actions", "out_dtype"))
def dqn_forward_linear(obs, w_p, b_p, *, n_actions, out_dtype=jnp.float32):
    """dataset in {'bdd100k','cityscapes','kitti'}: actions = obs @ W + b.
    obs:[B,512] (f32 or bf16, DMA'd as stored), w_p/b_p from prepare_linear_params."""
    B, D = obs.shape
    n_pad = w_p.shape[1]
    tile_b = _batch_tile(B, _sublane(obs.dtype))

    out = pl.pallas_call(
        _linear_kernel,
        out_shape=jax.ShapeDtypeStruct((B, n_pad), out_dtype),
        grid_spec=pltpu.PrefetchScalarGridSpec(
            num_scalar_prefetch=0,
            grid=(pl.cdiv(B, tile_b),),
            in_specs=[
                pl.BlockSpec((tile_b, D), lambda i: (i, 0)),   # obs tile (pipelined)
                pl.BlockSpec((D, n_pad), lambda i: (0, 0)),    # weight resident in VMEM
                pl.BlockSpec((1, n_pad), lambda i: (0, 0)),    # bias resident in VMEM
            ],
            out_specs=pl.BlockSpec((tile_b, n_pad), lambda i: (i, 0)),
        ),
        compiler_params=pltpu.CompilerParams(
            dimension_semantics=("parallel",),                 # megacore on v7x
        ),
    )(obs, w_p, b_p)
    return out[:, :n_actions]


@functools.partial(jax.jit, static_argnames=("n_actions", "out_dtype"))
def dqn_forward_mlp(obs, params, *, n_actions, out_dtype=jnp.float32):
    """Other datasets (n_layers=3): ReLU-MLP 256->256->256->n_actions.
    obs:[B,256], params from prepare_mlp_params."""
    w1_p, b1_p, w2_p, b2_p, w3_p, b3_p = params
    B, D = obs.shape
    H = w1_p.shape[1]
    n_pad = w3_p.shape[1]
    tile_b = _batch_tile(B, _sublane(obs.dtype))

    out = pl.pallas_call(
        _mlp_kernel,
        out_shape=jax.ShapeDtypeStruct((B, n_pad), out_dtype),
        grid_spec=pltpu.PrefetchScalarGridSpec(
            num_scalar_prefetch=0,
            grid=(pl.cdiv(B, tile_b),),
            in_specs=[
                pl.BlockSpec((tile_b, D), lambda i: (i, 0)),   # obs tile (pipelined)
                pl.BlockSpec((D, H), lambda i: (0, 0)),
                pl.BlockSpec((1, H), lambda i: (0, 0)),
                pl.BlockSpec((H, H), lambda i: (0, 0)),
                pl.BlockSpec((1, H), lambda i: (0, 0)),
                pl.BlockSpec((H, n_pad), lambda i: (0, 0)),
                pl.BlockSpec((1, n_pad), lambda i: (0, 0)),
            ],
            out_specs=pl.BlockSpec((tile_b, n_pad), lambda i: (i, 0)),
        ),
        compiler_params=pltpu.CompilerParams(
            dimension_semantics=("parallel",),
        ),
    )(obs, w1_p, b1_p, w2_p, b2_p, w3_p, b3_p)
    return out[:, :n_actions]


# ------------------------------ parameter init --------------------------------

def _init_linear(key, fan_in, fan_out, dtype=jnp.float32):
    """PyTorch nn.Linear default init: U(-1/sqrt(fan_in), 1/sqrt(fan_in)); stored [in, out]."""
    kw, kb = jax.random.split(key)
    bound = 1.0 / jnp.sqrt(jnp.asarray(fan_in, dtype))
    w = jax.random.uniform(kw, (fan_in, fan_out), dtype, -bound, bound)
    b = jax.random.uniform(kb, (fan_out,), dtype, -bound, bound)
    return w, b


# ----------------------------------- main --------------------------------------

if __name__ == "__main__":
    key = jax.random.PRNGKey(0)
    k_obs, k_fc, k_m1, k_m2, k_m3, k_obs2, k_obs3 = jax.random.split(key, 7)

    n_actions = 6
    B = 2   # tiny act-time batch; ragged rows handled by Pallas boundary clipping

    # --- default path: dataset='bdd100k' -> single Linear(512, 6) ---
    obs = jax.random.normal(k_obs, (B, 512), jnp.float32)
    w, b = _init_linear(k_fc, 512, n_actions)
    ref = obs @ w + b[None, :]

    # f32 MXU inputs: parity with the PyTorch module
    w_f32, b_f32 = prepare_linear_params(w, b, compute_dtype=jnp.float32)
    act_f32 = jax.block_until_ready(
        dqn_forward_linear(obs, w_f32, b_f32, n_actions=n_actions))
    assert act_f32.shape == (B, n_actions)
    assert jnp.allclose(act_f32, ref, atol=1e-5, rtol=1e-5)

    # bf16 MXU inputs (default prep): f32 accumulation/epilogue -> relaxed tolerance
    w_bf16, b_bf16 = prepare_linear_params(w, b)
    act_bf16 = jax.block_until_ready(
        dqn_forward_linear(obs, w_bf16, b_bf16, n_actions=n_actions))
    assert act_bf16.shape == (B, n_actions)
    assert jnp.allclose(act_bf16, ref, atol=2e-2, rtol=2e-2)

    # multi-step grid + ragged last batch tile (B=520 -> tile 512, grid 2, 8-row tail)
    B2 = 520
    obs_big = jax.random.normal(k_obs3, (B2, 512), jnp.float32)
    ref_big = obs_big @ w + b[None, :]
    act_big = jax.block_until_ready(
        dqn_forward_linear(obs_big, w_f32, b_f32, n_actions=n_actions))
    assert act_big.shape == (B2, n_actions)
    assert jnp.allclose(act_big, ref_big, atol=1e-4, rtol=1e-4)

    # --- alternate path: other datasets -> 3-layer MLP (256 -> 256 -> 256 -> 6) ---
    obs_mlp = jax.random.normal(k_obs2, (B, 256), jnp.float32)
    w1, b1 = _init_linear(k_m1, 256, 256)
    w2, b2 = _init_linear(k_m2, 256, 256)
    w3, b3 = _init_linear(k_m3, 256, n_actions)
    h = jnp.maximum(obs_mlp @ w1 + b1, 0.0)
    h = jnp.maximum(h @ w2 + b2, 0.0)
    ref_mlp = h @ w3 + b3

    mlp_f32 = prepare_mlp_params((w1, b1, w2, b2, w3, b3), compute_dtype=jnp.float32)
    act_mlp = jax.block_until_ready(
        dqn_forward_mlp(obs_mlp, mlp_f32, n_actions=n_actions))
    assert act_mlp.shape == (B, n_actions)
    assert jnp.allclose(act_mlp, ref_mlp, atol=1e-4, rtol=1e-4)

    mlp_bf16 = prepare_mlp_params((w1, b1, w2, b2, w3, b3))
    act_mlp_bf = jax.block_until_ready(
        dqn_forward_mlp(obs_mlp, mlp_bf16, n_actions=n_actions))
    assert act_mlp_bf.shape == (B, n_actions)
    assert jnp.allclose(act_mlp_bf, ref_mlp, atol=5e-2, rtol=5e-2)

    print("KERNEL_OK")
</pallas_src>

<mosaic_0001>
module attributes {stable_mosaic.version = 11 : i64} {
  func.func @_linear_kernel(%arg0: i32, %arg1: memref<8x512xf32, #tpu.memory_space<vmem>>, %arg2: memref<512x128xf32, #tpu.memory_space<vmem>>, %arg3: memref<1x128xf32, #tpu.memory_space<vmem>>, %arg4: memref<8x128xf32, #tpu.memory_space<vmem>>) attributes {dimension_semantics = [#tpu.dimension_semantics<parallel>], iteration_bounds = array<i64: 1>, scalar_prefetch = 0 : i64, scratch_operands = 0 : i64, tpu.core_type = #tpu.core_type<tc>, window_params = [{transform_indices = @transform_0, window_bounds = array<i64: 8, 512>}, {pipeline_mode = #tpu.pipeline_mode<synchronous>, transform_indices = @transform_1, window_bounds = array<i64: 512, 128>}, {pipeline_mode = #tpu.pipeline_mode<synchronous>, transform_indices = @transform_2, window_bounds = array<i64: 1, 128>}, {transform_indices = @transform_3, window_bounds = array<i64: 8, 128>}]} {
    %c0 = arith.constant 0 : index
    %c0_0 = arith.constant 0 : index
    %0 = vector.load %arg1[%c0, %c0_0] : memref<8x512xf32, #tpu.memory_space<vmem>>, vector<8x512xf32>
    %c0_1 = arith.constant 0 : index
    %c0_2 = arith.constant 0 : index
    %1 = vector.load %arg2[%c0_1, %c0_2] : memref<512x128xf32, #tpu.memory_space<vmem>>, vector<512x128xf32>
    %cst = arith.constant dense<0.000000e+00> : vector<8x128xf32>
    %2 = tpu.matmul %0, %1, %cst {dimension_numbers = #tpu.dot_dimension_numbers<[1], [0], [0], [1], [0, 0, 1, 1], [], []>} : vector<8x512xf32>, vector<512x128xf32>, vector<8x128xf32> -> vector<8x128xf32>
    %c0_3 = arith.constant 0 : index
    %c0_4 = arith.constant 0 : index
    %3 = vector.load %arg3[%c0_3, %c0_4] : memref<1x128xf32, #tpu.memory_space<vmem>>, vector<1x128xf32>
    %4 = vector.broadcast %3 : vector<1x128xf32> to vector<8x128xf32>
    %5 = arith.addf %2, %4 : vector<8x128xf32>
    %c0_5 = arith.constant 0 : index
    %c0_6 = arith.constant 0 : index
    %6 = vector.load %arg4[%c0_5, %c0_6] : memref<8x128xf32, #tpu.memory_space<vmem>>, vector<8x128xf32>
    tpu.vector_store %arg4[%c0_5, %c0_6], %5 {strides = array<i32>} : memref<8x128xf32, #tpu.memory_space<vmem>>, vector<8x128xf32>,
    return
  }
  func.func @transform_0(%arg0: i32) -> (i32, i32) {
    %c0_i32 = arith.constant 0 : i32
    %c0_i32_0 = arith.constant 0 : i32
    return %arg0, %c0_i32 : i32, i32
  }
  func.func @transform_1(%arg0: i32) -> (i32, i32) {
    %c0_i32 = arith.constant 0 : i32
    %c0_i32_0 = arith.constant 0 : i32
    %c0_i32_1 = arith.constant 0 : i32
    return %c0_i32, %c0_i32_0 : i32, i32
  }
  func.func @transform_2(%arg0: i32) -> (i32, i32) {
    %c0_i32 = arith.constant 0 : i32
    %c0_i32_0 = arith.constant 0 : i32
    %c0_i32_1 = arith.constant 0 : i32
    return %c0_i32, %c0_i32_0 : i32, i32
  }
  func.func @transform_3(%arg0: i32) -> (i32, i32) {
    %c0_i32 = arith.constant 0 : i32
    %c0_i32_0 = arith.constant 0 : i32
    return %arg0, %c0_i32 : i32, i32
  }
}

</mosaic_0001>

<bundles_post_ra>
// kernel: dqn_forward_linear.1
= control target key start
LH: loop header
LB: loop body
LE: loop exit
PB: predicated region body
PF: predicated region fallthrough
CT: control target
= control target key end

     0   :  { %8 = vsyncpa [#allocation3], 0  ;;  %s609_s0 = inlined_call_operand.hbm [shape: f32[2,512], index: 0, kind: input, shape index: {}]   ;;  %s610_s1 = inlined_call_operand.hbm [shape: f32[512,128], index: 1, kind: input, shape index: {}]   ;;  %s611_s2 = inlined_call_operand.vmem [shape: f32[1,128], index: 2, kind: input, shape index: {}]   ;;  %s612_s3 = inlined_call_operand.hbm [shape: f32[2,128], index: 3, kind: output, shape index: {}]  }
   0x1   :  { %9 = vsyncpa [#allocation6], 0 }
   0x2   :  { %10 = vsyncpa [#allocation4], 0 }
   0x3   :  { %15 = vsyncadd [#allocation3], 384  ;;  %s542_s12 = smov [#allocation2]   ;;  %s470_s16 = scalar_lea.hbm %s609_s0, 128 }
   0x4   :  { %s16_s13 = sshll.u32 %s542_s12, 4  ;;  %p471_p0 = scmp.ne.s32.totalorder %s609_s0, %s470_s16  ;;  %s17_s13 = int_to_ptr.vmem [resolvable:$true] %s16_s13 }
   0x5   :  { %p474_p1 = scmp.lt.u32.totalorder %s470_s16, %s609_s0 }
   0x7   :  { %p476_p2 = pnand %p474_p1, %p471_p0 }
   0x9   :  { %479 = shalt.err (!%p476_p2)
}
   0xa   :  { %s480_s21 = scalar_lea.vmem %s17_s13, 128  ;;  %s484_s22 = scalar_lea.vmem %s17_s13, 512 }
   0xb   :  { %p481_p3 = scmp.ne.s32.totalorder %s17_s13, %s480_s21  ;;  %p485_p4 = scmp.lt.s32.totalorder %s17_s13, %s17_s13 }
   0xc   :  { %p486_p5 = scmp.lt.s32.totalorder %s484_s22, %s480_s21 }
   0xe   :  { %p487_p6 = por %p486_p5, %p485_p4 }
  0x10   :  { %p488_p7 = pnand %p487_p6, %p481_p3 }
  0x12   :  { %491 = shalt.err (!%p488_p7)
}
  0x13   :  { %s543_s23 = smov 128   ;;  %s544_s24 = smov 8  }
  0x14   :  { %22 = dma.hbm_to_vmem [thread:$0]  %s609_s0, 128, %s17_s13, [#allocation3], %s543_s23, %s543_s23, %s544_s24  }
  0x15   :  { %s545_s27 = smov [#allocation5]   ;;  %s492_s4 = scalar_lea.hbm %s610_s1, 8192 }
  0x16   :  { %s28_s28 = sshll.u32 %s545_s27, 4  ;;  %p493_p8 = scmp.ne.s32.totalorder %s610_s1, %s492_s4  ;;  %s29_s28 = int_to_ptr.vmem [resolvable:$true] %s28_s28 }
  0x17   :  { %p496_p9 = scmp.lt.u32.totalorder %s492_s4, %s610_s1 }
  0x19   :  { %p498_p10 = pnand %p496_p9, %p493_p8 }
  0x1b   :  { %501 = shalt.err (!%p498_p10)
}
  0x1c   :  { %s502_s9 = scalar_lea.vmem %s29_s28, 8192  ;;  %p507_p12 = scmp.lt.s32.totalorder %s29_s28, %s29_s28 }
  0x1d   :  { %p503_p11 = scmp.ne.s32.totalorder %s29_s28, %s502_s9  ;;  %p508_p13 = scmp.lt.s32.totalorder %s502_s9, %s502_s9 }
  0x1f   :  { %p509_p0 = por %p508_p13, %p507_p12 }
  0x21   :  { %p510_p1 = pnand %p509_p0, %p503_p11 }
  0x23   :  { %513 = shalt.err (!%p510_p1)
}
  0x24   :  { %34 = dma.hbm_to_vmem [thread:$0]  %s610_s1, 8192, %s29_s28, [#allocation6], %s543_s23, %s543_s23, %s544_s24  }
  0x25   :  { %536 = dma.done.wait [#allocation3], 512  }
  0x26   :  { %537 = vsyncadd [#allocation3], 4294966784 }
  0x27   :  { %538 = dma.done.wait [#allocation6], 8192  }
  0x28   :  { %539 = vsyncadd [#allocation6], 4294959104  ;;  %v63_v0 = vld [vmem:[#allocation5 + $0x80] sm:$0xff]  ;;  %v64_v1 = vld [vmem:[#allocation5 + $0x88] sm:$0xff]  ;;  %v546_v51 = vmov 1983009808   ;;  %v129_v53 = vlaneseq }
  0x29   :  { %v47_v2 = vld [vmem:[#allocation5] sm:$0xff]  ;;  %v392_v3 = vpack.c.bf16 %v64_v1, %v63_v0  ;;  %v48_v4 = vld [vmem:[#allocation5 + $0x8] sm:$0xff]  ;;  %v65_v11 = vld [vmem:[#allocation5 + $0x90] sm:$0xff]  ;;  %v127_v52 = vunpack.c.l.s4 %v546_v51 }
  0x2a   :  { %v95_v5 = vld [vmem:[#allocation5 + $0x180] sm:$0xff]  ;;  %v96_v6 = vld [vmem:[#allocation5 + $0x188] sm:$0xff]  ;;  %v394_v7 = vpack.c.bf16 %v48_v4, %v47_v2  ;;  %v66_v13 = vld [vmem:[#allocation5 + $0x98] sm:$0xff] }
  0x2b   :  { %v424_v8 = vpack.c.bf16 %v96_v6, %v95_v5  ;;  %v79_v9 = vld [vmem:[#allocation5 + $0x100] sm:$0xff]  ;;  %v80_v10 = vld [vmem:[#allocation5 + $0x108] sm:$0xff]  ;;  %393 = vmatprep.subr.bf16.mxu0 %v392_v3  ;;  %v49_v14 = vld [vmem:[#allocation5 + $0x10] sm:$0xff]  ;;  %v396_v16 = vpack.c.bf16 %v66_v13, %v65_v11  ;;  %v128_v2 = vunpack.c.0.s8 %v127_v52  ;;  %v130_v3 = vshrl.u32 %v129_v53, 7 }
  0x2c   :  { %v426_v12 = vpack.c.bf16 %v80_v10, %v79_v9  ;;  %v50_v15 = vld [vmem:[#allocation5 + $0x18] sm:$0xff]  ;;  %395 = vmatpush3.bf16.msra.mxu0 %v394_v7  ;;  %v97_v18 = vld [vmem:[#allocation5 + $0x190] sm:$0xff]  ;;  %v67_v23 = vld [vmem:[#allocation5 + $0xa0] sm:$0xff] }
  0x2d   :  { %425 = vmatprep.subr.bf16.mxu1 %v424_v8  ;;  %v398_v17 = vpack.c.bf16 %v50_v15, %v49_v14  ;;  %v98_v19 = vld [vmem:[#allocation5 + $0x198] sm:$0xff]  ;;  %v81_v20 = vld [vmem:[#allocation5 + $0x110] sm:$0xff]  ;;  %v68_v24 = vld [vmem:[#allocation5 + $0xa8] sm:$0xff]  ;;  %397 = vmatprep.subr.bf16.mxu0 %v396_v16 }
  0x2e   :  { %427 = vmatpush3.bf16.msra.mxu1 %v426_v12  ;;  %v428_v21 = vpack.c.bf16 %v98_v19, %v97_v18  ;;  %v82_v22 = vld [vmem:[#allocation5 + $0x118] sm:$0xff]  ;;  %v400_v26 = vpack.c.bf16 %v68_v24, %v67_v23  ;;  %v51_v27 = vld [vmem:[#allocation5 + $0x20] sm:$0xff]  ;;  %v52_v28 = vld [vmem:[#allocation5 + $0x28] sm:$0xff] }
  0x2f   :  { %v430_v25 = vpack.c.bf16 %v82_v22, %v81_v20  ;;  %v99_v29 = vld [vmem:[#allocation5 + $0x1a0] sm:$0xff]  ;;  %v100_v30 = vld [vmem:[#allocation5 + $0x1a8] sm:$0xff]  ;;  %v402_v33 = vpack.c.bf16 %v52_v28, %v51_v27  ;;  %v69_v35 = vld [vmem:[#allocation5 + $0xb0] sm:$0xff]  ;;  %v131_v22 = vsub.s32 %v128_v2, %v130_v3 }
  0x30   :  { %429 = vmatprep.subr.bf16.mxu1 %v428_v21  ;;  %v83_v31 = vld [vmem:[#allocation5 + $0x120] sm:$0xff]  ;;  %v84_v32 = vld [vmem:[#allocation5 + $0x128] sm:$0xff]  ;;  %399 = vmatpush3.bf16.msra.mxu0 %v398_v17  ;;  %v432_v34 = vpack.c.bf16 %v100_v30, %v99_v29  ;;  %v70_v36 = vld [vmem:[#allocation5 + $0xb8] sm:$0xff] }
  0x31   :  { %v53_v37 = vld [vmem:[#allocation5 + $0x30] sm:$0xff]  ;;  %401 = vmatprep.subr.bf16.mxu0 %v400_v26  ;;  %v434_v38 = vpack.c.bf16 %v84_v32, %v83_v31  ;;  %v404_v39 = vpack.c.bf16 %v70_v36, %v69_v35  ;;  %v54_v40 = vld [vmem:[#allocation5 + $0x38] sm:$0xff]  ;;  %v71_v46 = vld [vmem:[#allocation5 + $0xc0] sm:$0xff] }
  0x32   :  { %431 = vmatpush3.bf16.msra.mxu1 %v430_v25  ;;  %v101_v41 = vld [vmem:[#allocation5 + $0x1b0] sm:$0xff]  ;;  %v102_v42 = vld [vmem:[#allocation5 + $0x1b8] sm:$0xff]  ;;  %v72_v47 = vld [vmem:[#allocation5 + $0xc8] sm:$0xff]  ;;  %v406_v48 = vpack.c.bf16 %v54_v40, %v53_v37 }
  0x33   :  { %433 = vmatprep.subr.bf16.mxu1 %v432_v34  ;;  %v436_v43 = vpack.c.bf16 %v102_v42, %v101_v41  ;;  %v85_v44 = vld [vmem:[#allocation5 + $0x130] sm:$0xff]  ;;  %v86_v45 = vld [vmem:[#allocation5 + $0x138] sm:$0xff]  ;;  %v103_v49 = vld [vmem:[#allocation5 + $0x1c0] sm:$0xff]  ;;  %v408_v55 = vpack.c.bf16 %v72_v47, %v71_v46 }
  0x34   :  { %403 = vmatpush3.bf16.msra.mxu0 %v402_v33  ;;  %v104_v50 = vld [vmem:[#allocation5 + $0x1c8] sm:$0xff]  ;;  %v438_v54 = vpack.c.bf16 %v86_v45, %v85_v44  ;;  %v55_v56 = vld [vmem:[#allocation5 + $0x40] sm:$0xff]  ;;  %v73_v61 = vld [vmem:[#allocation5 + $0xd0] sm:$0xff] }
  0x35   :  { %405 = vmatprep.subr.bf16.mxu0 %v404_v39  ;;  %v56_v57 = vld [vmem:[#allocation5 + $0x48] sm:$0xff]  ;;  %v87_v58 = vld [vmem:[#allocation5 + $0x140] sm:$0xff]  ;;  %v440_v59 = vpack.c.bf16 %v104_v50, %v103_v49  ;;  %v74_v62 = vld [vmem:[#allocation5 + $0xd8] sm:$0xff] }
  0x36   :  { %435 = vmatpush3.bf16.msra.mxu1 %v434_v38  ;;  %v88_v60 = vld [vmem:[#allocation5 + $0x148] sm:$0xff]  ;;  %v105_v63 = vld [vmem:[#allocation5 + $0x1d0] sm:$0xff]  ;;  %v106_v0 = vld [vmem:[#allocation5 + $0x1d8] sm:$0xff]  ;;  %v410_v1 = vpack.c.bf16 %v56_v57, %v55_v56  ;;  %v412_v5 = vpack.c.bf16 %v74_v62, %v73_v61 }
  0x37   :  { %437 = vmatprep.subr.bf16.mxu1 %v436_v43  ;;  %v442_v4 = vpack.c.bf16 %v88_v60, %v87_v58  ;;  %v57_v6 = vld [vmem:[#allocation5 + $0x50] sm:$0xff]  ;;  %v58_v7 = vld [vmem:[#allocation5 + $0x58] sm:$0xff]  ;;  %v444_v9 = vpack.c.bf16 %v106_v0, %v105_v63  ;;  %v75_v11 = vld [vmem:[#allocation5 + $0xe0] sm:$0xff] }
  0x38   :  { %407 = vmatpush3.bf16.msra.mxu0 %v406_v48  ;;  %v89_v8 = vld [vmem:[#allocation5 + $0x150] sm:$0xff]  ;;  %v90_v10 = vld [vmem:[#allocation5 + $0x158] sm:$0xff]  ;;  %v76_v12 = vld [vmem:[#allocation5 + $0xe8] sm:$0xff]  ;;  %v414_v18 = vpack.c.bf16 %v58_v7, %v57_v6 }
  0x39   :  { %409 = vmatprep.subr.bf16.mxu0 %v408_v55  ;;  %v59_v13 = vld [vmem:[#allocation5 + $0x60] sm:$0xff]  ;;  %v60_v14 = vld [vmem:[#allocation5 + $0x68] sm:$0xff]  ;;  %v77_v20 = vld [vmem:[#allocation5 + $0xf0] sm:$0xff]  ;;  %v446_v23 = vpack.c.bf16 %v90_v10, %v89_v8  ;;  %v416_v24 = vpack.c.bf16 %v76_v12, %v75_v11 }
  0x3a   :  { %439 = vmatpush3.bf16.msra.mxu1 %v438_v54  ;;  %v107_v15 = vld [vmem:[#allocation5 + $0x1e0] sm:$0xff]  ;;  %v108_v16 = vld [vmem:[#allocation5 + $0x1e8] sm:$0xff]  ;;  %v78_v21 = vld [vmem:[#allocation5 + $0xf8] sm:$0xff]  ;;  %v418_v32 = vpack.c.bf16 %v60_v14, %v59_v13 }
  0x3b   :  { %441 = vmatprep.subr.bf16.mxu1 %v440_v59  ;;  %v91_v17 = vld [vmem:[#allocation5 + $0x160] sm:$0xff]  ;;  %v92_v19 = vld [vmem:[#allocation5 + $0x168] sm:$0xff]  ;;  %v109_v25 = vld [vmem:[#allocation5 + $0x1f0] sm:$0xff]  ;;  %v448_v27 = vpack.c.bf16 %v108_v16, %v107_v15  ;;  %v420_v34 = vpack.c.bf16 %v78_v21, %v77_v20 }
  0x3c   :  { %411 = vmatpush3.bf16.msra.mxu0 %v410_v1  ;;  %v110_v26 = vld [vmem:[#allocation5 + $0x1f8] sm:$0xff]  ;;  %v464_v28 = vld [vmem:[#allocation2] ss:$8 sps:$4 sm:$0xff]   ;;  %v468_v30 = vld [vmem:[#allocation2 + $0x4] ss:$8 sps:$4 sm:$0xff]   ;;  %v450_v33 = vpack.c.bf16 %v92_v19, %v91_v17 }
  0x3d   :  { %413 = vmatprep.subr.bf16.mxu0 %v412_v5  ;;  %v466_v29 = vld [vmem:[#allocation2 + $0x10] ss:$8 sps:$4 sm:$0xff]   ;;  %v469_v31 = vld [vmem:[#allocation2 + $0x14] ss:$8 sps:$4 sm:$0xff]   ;;  %v132_v35 = vrot.slane %v464_v28, %v131_v22  ;;  %v139_v39 = vrot.slane %v468_v30, %v131_v22  ;;  %v452_v41 = vpack.c.bf16 %v110_v26, %v109_v25  ;;  %v321_v51 = vld [vmem:[%s611_s2] ss:$0 sm:$0xff] }
  0x3e   :  { %443 = vmatpush3.bf16.msra.mxu1 %v442_v4  ;;  %v61_v36 = vld [vmem:[#allocation5 + $0x70] sm:$0xff]  ;;  %v62_v37 = vld [vmem:[#allocation5 + $0x78] sm:$0xff]  ;;  %v146_v38 = vrot.slane %v466_v29, %v131_v22  ;;  %v153_v40 = vrot.slane %v469_v31, %v131_v22 }
  0x3f   :  { %445 = vmatprep.subr.bf16.mxu1 %v444_v9  ;;  %v93_v42 = vld [vmem:[#allocation5 + $0x170] sm:$0xff]  ;;  %v94_v43 = vld [vmem:[#allocation5 + $0x178] sm:$0xff]  ;;  %v422_v46 = vpack.c.bf16 %v62_v37, %v61_v36 }
  0x40   :  { %415 = vmatpush3.bf16.msra.mxu0 %v414_v18  ;;  %v155_v44 = vcombine.high %v132_v35, %v146_v38  ;;  %v157_v45 = vcombine.high %v139_v39, %v153_v40  ;;  %v454_v47 = vpack.c.bf16 %v94_v43, %v93_v42  ;;  %v154_v48 = vcombine.low %v132_v35, %v146_v38 }
  0x41   :  { %417 = vmatprep.subr.bf16.mxu0 %v416_v24  ;;  %v156_v49 = vcombine.low %v139_v39, %v153_v40 }
  0x42   :  { %447 = vmatpush3.bf16.msra.mxu1 %v446_v23  ;;  %226 = vmatprep.mubr.f32.mxu0 %v155_v44 }
  0x43   :  { %449 = vmatprep.subr.bf16.mxu1 %v448_v27  ;;  %296 = vmatprep.mubr.f32.mxu1 %v157_v45 }
  0x44   :  { %419 = vmatpush3.bf16.msra.mxu0 %v418_v32 }
  0x45   :  { %421 = vmatprep.subr.bf16.mxu0 %v420_v34 }
  0x46   :  { %451 = vmatpush3.bf16.msra.mxu1 %v450_v33 }
  0x47   :  { %453 = vmatprep.subr.bf16.mxu1 %v452_v41 }
  0x48   :  { %423 = vmatpush3.bf16.msra.mxu0 %v422_v46 }
  0x4a   :  { %455 = vmatpush3.bf16.msra.mxu1 %v454_v47 }
  0x4b   :  { %227 = vmatmul.mubr.f32.vlgmr.msra.gmra.mrb[0].mxu0 %v154_v48 }
  0x4d   :  { %297 = vmatmul.mubr.f32.vlgmr.msra.gmra.mrb[0].mxu1 %v156_v49 }
 0x11e   :  { %v354_v50 = vpop.f32.mrb[0].mxu0 }
 0x11f   :  { %v355_v52 = vpop.f32.mrb[1].mxu0 }
 0x120   :  { %v389_v53 = vpop.f32.mrb[0].mxu1  ;;  %v356_v54 = vadd.f32 %v355_v52, %v354_v50 }
 0x121   :  { %v390_v55 = vpop.f32.mrb[1].mxu1 }
 0x122   :  { %v391_v56 = vadd.f32 %v390_v55, %v389_v53  ;;  %v229_v57 = vadd.f32 %v356_v54, %v321_v51 }
 0x124   :  { %v299_v58 = vadd.f32 %v391_v56, %v229_v57 }
 0x126   :  { %302 = vst [vmem:[#allocation7] sm:$0xff] %v299_v58 }
 0x127   :  { %307 = vsyncadd [#allocation4], 96  ;;  %s547_s12 = smov [#allocation7]  }
 0x128   :  { %s308_s13 = sshll.u32 %s547_s12, 4  ;;  %s309_s13 = int_to_ptr.vmem [resolvable:$true] %s308_s13 }
 0x129   :  { %s514_s14 = scalar_lea.vmem %s309_s13, 32  ;;  %s518_s15 = scalar_lea.vmem %s309_s13, 128 }
 0x12a   :  { %p515_p2 = scmp.ne.s32.totalorder %s309_s13, %s514_s14  ;;  %p519_p3 = scmp.lt.s32.totalorder %s309_s13, %s309_s13 }
 0x12b   :  { %p520_p4 = scmp.lt.s32.totalorder %s518_s15, %s514_s14 }
 0x12d   :  { %p521_p5 = por %p520_p4, %p519_p3 }
 0x12f   :  { %p522_p6 = pnand %p521_p5, %p515_p2 }
 0x131   :  { %525 = shalt.err (!%p522_p6)
}
 0x132   :  { %s526_s17 = scalar_lea.hbm %s612_s3, 32 }
 0x133   :  { %p527_p7 = scmp.ne.s32.totalorder %s612_s3, %s526_s17  ;;  %p530_p8 = scmp.lt.u32.totalorder %s526_s17, %s612_s3 }
 0x135   :  { %p532_p9 = pnand %p530_p8, %p527_p7 }
 0x137   :  { %535 = shalt.err (!%p532_p9)
}
 0x138   :  { %s548_s22 = smov 32   ;;  %s549_s23 = smov 2  }
 0x139   :  { %314 = dma.vmem_to_hbm [thread:$0]  %s309_s13, 32, %s612_s3, [#allocation4], %s548_s22, %s548_s22, %s549_s23  }
 0x13a   :  { %540 = dma.done.wait [#allocation4], 128  }
 0x13b   :  { %541 = vsyncadd [#allocation4], 4294967168 }
 0x13c   :  { %318 = vsyncpa [#allocation3], 1 }
 0x13d   :  { %319 = vsyncpa [#allocation6], 1 }
 0x13e   :  { %320 = vsyncpa [#allocation4], 1 }

</bundles_post_ra>
